<compile_context>
chip_gen: v5e
topology: v5e:2x2
jax: 0.10.0
libtpu: 0.0.40
codegen_flags: <defaults>
</compile_context>

<pallas_src>
from functools import partial

import numpy as np

import jax
import jax.numpy as jnp
from jax.experimental import pallas as pl
from jax.experimental.pallas import tpu as pltpu

BN_EPS = 1e-4
LEAKY_SLOPE = 0.1


# ---------------------------------------------------------------------------
# Fused kernel: depthwise 3x3/s2 + BN1 + LeakyReLU  ->  pointwise 1x1 + BN2
# ---------------------------------------------------------------------------
def _fused_dw_pw_kernel(xm_ref, xh_ref, wdw_ref, b1_ref, wpw_ref, b2_ref, o_ref,
                        *, row_tile, w_out):
    """One (batch, output-row-tile) block per grid step.

    xm_ref : (1, 4, TR, wp, C_in)   parity planes, rows [r*TR, r*TR+TR)
                                    plane p = 2*(row parity) + (col parity)
    xh_ref : (1, 2, 1, wp, C_in)    halo: plane row r*TR+TR of the even-row planes
    wdw_ref: (9, C_in)              depthwise taps (kh*3+kw, c), BN1 scale folded
    b1_ref : (1, C_in)              BN1 bias (f32)
    wpw_ref: (C_out, C_in)          pointwise weight (transposed), BN2 scale folded
    b2_ref : (C_out, 1)             BN2 bias (f32)
    o_ref  : (1, C_out, TR*w_out)   NCHW-layout output rows for this tile
    """
    wdw = wdw_ref[...].astype(jnp.float32)          # (9, C_in), tiny & resident

    # Depthwise 3x3 / stride 2 / pad 1: each tap is a unit-stride static slice
    # taken straight from the ref (no materialized plane copies).  Local output
    # row a + kernel row kh reads plane row a + kh//2; kh == 2 needs the one-row
    # halo from xh_ref.
    acc = None
    for kh in range(3):
        for kw in range(3):
            p = (kh % 2) * 2 + (kw % 2)
            c0 = kw // 2
            if kh < 2:
                tap = xm_ref[0, p, :, c0:c0 + w_out, :]
            else:
                parts = []
                if row_tile > 1:
                    parts.append(xm_ref[0, p, 1:row_tile, c0:c0 + w_out, :])
                parts.append(xh_ref[0, p, :, c0:c0 + w_out, :])
                tap = parts[0] if len(parts) == 1 else jnp.concatenate(parts, axis=0)
            term = tap.astype(jnp.float32) * wdw[kh * 3 + kw, :]
            acc = term if acc is None else acc + term      # 1st tap initializes acc

    y = acc + b1_ref[0, :]                           # folded BN1 bias
    y = jnp.where(y > 0, y, LEAKY_SLOPE * y)         # LeakyReLU(0.1)

    # Pointwise 1x1 conv + BN2 bias as a transposed matmul on the MXU:
    #   (C_out, C_in) x (TR*w_out, C_in)^T -> (C_out, TR*w_out)
    # The result is already in flattened NCHW layout: spatial on the lane axis
    # (lane-dense stores), channels on sublanes.
    # NOTE: the reshape merges (TR, w_out) on the sublane/major axes only; it is
    # free when w_out is a multiple of 8 (true for typical even feature maps).
    y2 = y.reshape(row_tile * w_out, -1).astype(wpw_ref.dtype)
    z = jax.lax.dot_general(wpw_ref[...], y2,
                            dimension_numbers=(((1,), (1,)), ((), ())),
                            preferred_element_type=jnp.float32)
    z = z + b2_ref[...]
    o_ref[0] = z.astype(o_ref.dtype)


# ---------------------------------------------------------------------------
# Row-tile selection (VMEM budget, lane-dense output blocks)
# ---------------------------------------------------------------------------
def _round_up(x, m):
    return (x + m - 1) // m * m


def _pick_row_tile(h_out, w_out, c_in, c_out, in_itemsize,
                   budget_bytes=8 * 1024 * 1024):
    """Largest output-row tile TR (a divisor of h_out) whose double-buffered
    blocks fit `budget_bytes`, preferring lane-dense output blocks
    (TR*w_out a multiple of 128, or the whole image)."""
    wp = w_out + 1
    c_lane = _round_up(c_in, 128)                   # channels sit on the lane axis
    wp_sub = _round_up(wp, 8)

    def step_bytes(t):
        xm = 4 * t * wp_sub * c_lane * in_itemsize            # main input block
        xh = 2 * 1 * wp_sub * c_lane * in_itemsize            # halo input block
        out = _round_up(c_out, 8) * _round_up(t * w_out, 128) * 4
        acc = t * _round_up(w_out, 8) * c_lane * 4            # f32 accumulator
        return 2 * (xm + xh + out) + acc                      # 2x: double-buffering

    cands = [t for t in range(1, h_out + 1)
             if h_out % t == 0 and (t == h_out or (t * w_out) % 128 == 0)]
    fitting = [t for t in cands if step_bytes(t) <= budget_bytes]
    return max(fitting) if fitting else min(cands)


# ---------------------------------------------------------------------------
# Wrapper
# ---------------------------------------------------------------------------
def depthwise_conv_down(x_nchw, params, *, storage_dtype=jnp.bfloat16,
                        row_tile=None):
    """Fused depthwise-3x3/s2 + BN + LeakyReLU + pointwise-1x1 + BN (inference)."""
    (w_dw, scale1, bias1, w_pw, scale2, bias2) = params
    n, c_in, h, w = x_nchw.shape
    c_out = w_pw.shape[1]
    assert h % 2 == 0 and w % 2 == 0, "stride-2 downsample expects even H, W"
    h_out, w_out = h // 2, w // 2
    hp, wp = h_out + 1, w_out + 1

    if row_tile is None:
        row_tile = _pick_row_tile(h_out, w_out, c_in, c_out,
                                  np.dtype(storage_dtype).itemsize)
    assert h_out % row_tile == 0, (h_out, row_tile)
    n_row_tiles = h_out // row_tile

    # ---- staging: NCHW -> NHWC, pad by 1, stride-2 parity split --------------
    # xp[n, 2*br+bc, a, c, :] == x_pad[n, 2*a+br, 2*c+bc, :], so every 3x3/s2
    # tap becomes a contiguous unit-stride slice inside the kernel.
    x = jnp.transpose(x_nchw, (0, 2, 3, 1)).astype(storage_dtype)
    x_pad = jnp.pad(x, ((0, 0), (1, 1), (1, 1), (0, 0)))
    xp = x_pad.reshape(n, hp, 2, wp, 2, c_in)
    xp = jnp.transpose(xp, (0, 2, 4, 1, 3, 5)).reshape(n, 4, hp, wp, c_in)
    # TODO(synk): this staging pass costs one extra HBM round trip of the input;
    # in production keep activations NHWC end-to-end, or try
    # pltpu.CompilerParams(allow_input_fusion=[0, 1]) to fuse the pad/parity
    # split into the pallas_call, or DMA raw row pairs via memory_space=pl.ANY
    # and split parity in VMEM.
    # TODO(synk): YOLO-Fastest's small C_in (4..64) under-fills the 128-wide
    # lane axis and the MXU contraction; pack several images' channels (or
    # pad/stack channels to 128) per block to recover VPU/MXU/DMA efficiency.

    # ---- fold BN scales into the conv weights (exact) ------------------------
    w_dw_f = (w_dw * scale1[None, :]).astype(storage_dtype)        # (9, C_in)
    w_pw_t = (w_pw * scale2[None, :]).T.astype(storage_dtype)      # (C_out, C_in)
    b1 = bias1.reshape(1, c_in).astype(jnp.float32)
    b2 = bias2.reshape(c_out, 1).astype(jnp.float32)

    out_flat = pl.pallas_call(
        partial(_fused_dw_pw_kernel, row_tile=row_tile, w_out=w_out),
        out_shape=jax.ShapeDtypeStruct((n, c_out, h_out * w_out), x_nchw.dtype),
        grid=(n, n_row_tiles),
        in_specs=[
            # main rows [r*TR, r*TR+TR) of all 4 parity planes
            pl.BlockSpec((1, 4, row_tile, wp, c_in),
                         lambda b, r: (b, 0, r, 0, 0)),
            # 1-row halo: plane row (r+1)*TR of the even-row-parity planes
            # (same staged array passed a second time; block size 1 on the row
            # dim makes the block index an element index).
            pl.BlockSpec((1, 2, 1, wp, c_in),
                         lambda b, r: (b, 0, (r + 1) * row_tile, 0, 0)),
            pl.BlockSpec((9, c_in), lambda b, r: (0, 0)),        # VMEM-resident
            pl.BlockSpec((1, c_in), lambda b, r: (0, 0)),        # VMEM-resident
            pl.BlockSpec((c_out, c_in), lambda b, r: (0, 0)),    # VMEM-resident
            pl.BlockSpec((c_out, 1), lambda b, r: (0, 0)),       # VMEM-resident
        ],
        out_specs=pl.BlockSpec((1, c_out, row_tile * w_out),
                               lambda b, r: (b, 0, r)),
        compiler_params=pltpu.CompilerParams(
            dimension_semantics=("parallel", "parallel"),
            vmem_limit_bytes=48 * 1024 * 1024),
    )(xp, xp, w_dw_f, b1, w_pw_t, b2)

    # Output is already (flattened) NCHW: a reshape is all that is needed.
    return out_flat.reshape(n, c_out, h_out, w_out)


# ---------------------------------------------------------------------------
# Pure-JAX references (lax.conv) for correctness verification
# ---------------------------------------------------------------------------
def reference(x_nchw, params):
    """Unfolded BN reference (conv -> scale -> bias), validates BN folding too."""
    (w_dw, scale1, bias1, w_pw, scale2, bias2) = params
    c_in = x_nchw.shape[1]
    w_dw_oihw = jnp.transpose(w_dw.reshape(3, 3, c_in), (2, 0, 1))[:, None, :, :]
    w_pw_oihw = jnp.transpose(w_pw, (1, 0))[:, :, None, None]

    y = jax.lax.conv_general_dilated(
        x_nchw, w_dw_oihw, window_strides=(2, 2), padding=((1, 1), (1, 1)),
        feature_group_count=c_in, dimension_numbers=("NCHW", "OIHW", "NCHW"))
    y = y * scale1[None, :, None, None] + bias1[None, :, None, None]
    y = jnp.where(y > 0, y, LEAKY_SLOPE * y)

    z = jax.lax.conv_general_dilated(
        y, w_pw_oihw, window_strides=(1, 1), padding=((0, 0), (0, 0)),
        dimension_numbers=("NCHW", "OIHW", "NCHW"))
    return z * scale2[None, :, None, None] + bias2[None, :, None, None]


def reference_folded(x_nchw, w_dw_f, bias1, w_pw_f, bias2):
    """Reference on already-folded (and possibly quantized) weights."""
    c_in = x_nchw.shape[1]
    w_dw_oihw = jnp.transpose(w_dw_f.reshape(3, 3, c_in), (2, 0, 1))[:, None, :, :]
    w_pw_oihw = jnp.transpose(w_pw_f, (1, 0))[:, :, None, None]

    y = jax.lax.conv_general_dilated(
        x_nchw, w_dw_oihw, window_strides=(2, 2), padding=((1, 1), (1, 1)),
        feature_group_count=c_in, dimension_numbers=("NCHW", "OIHW", "NCHW"))
    y = y + bias1[None, :, None, None]
    y = jnp.where(y > 0, y, LEAKY_SLOPE * y)

    z = jax.lax.conv_general_dilated(
        y, w_pw_oihw, window_strides=(1, 1), padding=((0, 0), (0, 0)),
        dimension_numbers=("NCHW", "OIHW", "NCHW"))
    return z + bias2[None, :, None, None]


def make_params(key, c_in, c_out):
    ks = jax.random.split(key, 8)
    # depthwise conv weight (torch: (C_in, 1, 3, 3)) stored as (9, C_in) = (kh*3+kw, c)
    w_dw = 0.2 * jax.random.normal(ks[0], (9, c_in), jnp.float32)
    gamma1 = 1.0 + 0.1 * jax.random.normal(ks[1], (c_in,), jnp.float32)
    beta1 = 0.1 * jax.random.normal(ks[2], (c_in,), jnp.float32)
    mean1 = 0.1 * jax.random.normal(ks[3], (c_in,), jnp.float32)
    var1 = jnp.abs(jax.random.normal(ks[4], (c_in,), jnp.float32)) + 0.5
    scale1 = gamma1 / jnp.sqrt(var1 + BN_EPS)
    bias1 = beta1 - mean1 * scale1

    # pointwise conv weight (torch: (C_out, C_in, 1, 1)) stored as (C_in, C_out)
    w_pw = 0.2 * jax.random.normal(ks[5], (c_in, c_out), jnp.float32)
    gamma2 = 1.0 + 0.1 * jax.random.normal(ks[6], (c_out,), jnp.float32)
    beta2 = 0.1 * jax.random.normal(ks[7], (c_out,), jnp.float32)
    mean2 = jnp.linspace(-0.1, 0.1, c_out, dtype=jnp.float32)
    var2 = jnp.linspace(0.5, 1.5, c_out, dtype=jnp.float32)
    scale2 = gamma2 / jnp.sqrt(var2 + BN_EPS)
    bias2 = beta2 - mean2 * scale2

    return (w_dw, scale1, bias1, w_pw, scale2, bias2)


if __name__ == "__main__":
    key = jax.random.PRNGKey(0)

    configs = [
        # (N, C_IN, C_OUT, H, W, row_tile)
        (2, 4, 8, 16, 16, None),   # single row-tile path (tile == full image)
        (2, 8, 16, 32, 32, 8),     # multi row-tile path (exercises the halo spec)
    ]

    for idx, (n, c_in, c_out, h, w, rt) in enumerate(configs):
        k_x, k_p, key = jax.random.split(key, 3)
        x = jax.random.normal(k_x, (n, c_in, h, w), jnp.float32)
        params = make_params(k_p, c_in, c_out)
        (w_dw, scale1, bias1, w_pw, scale2, bias2) = params

        # --- f32 path: exact check against the unfolded-BN lax.conv reference ---
        out32 = jax.block_until_ready(
            depthwise_conv_down(x, params, storage_dtype=jnp.float32, row_tile=rt))
        ref32 = jax.block_until_ready(reference(x, params))
        assert out32.shape == (n, c_out, h // 2, w // 2), out32.shape
        err32 = float(jnp.max(jnp.abs(out32 - ref32)))
        assert jnp.allclose(out32, ref32, rtol=1e-4, atol=1e-4), (idx, err32)

        # --- bf16 storage path (perf default): reference consumes the same
        #     bf16-quantized activations / folded weights as the kernel ---------
        outbf = jax.block_until_ready(
            depthwise_conv_down(x, params, storage_dtype=jnp.bfloat16, row_tile=rt))
        q = lambda a: a.astype(jnp.bfloat16).astype(jnp.float32)
        refbf = jax.block_until_ready(
            reference_folded(q(x), q(w_dw * scale1[None, :]), bias1,
                             q(w_pw * scale2[None, :]), bias2))
        errbf = float(jnp.max(jnp.abs(outbf - refbf)))
        assert jnp.allclose(outbf, refbf, rtol=3e-2, atol=3e-2), (idx, errbf)

    print("KERNEL_OK")
</pallas_src>

<mosaic_0001>
module attributes {stable_mosaic.version = 11 : i64} {
  func.func @_fused_dw_pw_kernel(%arg0: i32, %arg1: i32, %arg2: memref<1x4x8x9x4xf32, #tpu.memory_space<vmem>>, %arg3: memref<1x2x1x9x4xf32, #tpu.memory_space<vmem>>, %arg4: memref<9x4xf32, #tpu.memory_space<vmem>>, %arg5: memref<1x4xf32, #tpu.memory_space<vmem>>, %arg6: memref<8x4xf32, #tpu.memory_space<vmem>>, %arg7: memref<8x1xf32, #tpu.memory_space<vmem>>, %arg8: memref<1x8x64xf32, #tpu.memory_space<vmem>>) attributes {dimension_semantics = [#tpu.dimension_semantics<parallel>, #tpu.dimension_semantics<parallel>], iteration_bounds = array<i64: 2, 1>, scalar_prefetch = 0 : i64, scratch_operands = 0 : i64, tpu.core_type = #tpu.core_type<tc>, window_params = [{transform_indices = @transform_0, window_bounds = array<i64: 1, 4, 8, 9, 4>}, {transform_indices = @transform_1, window_bounds = array<i64: 1, 2, 1, 9, 4>}, {pipeline_mode = #tpu.pipeline_mode<synchronous>, transform_indices = @transform_2, window_bounds = array<i64: 9, 4>}, {pipeline_mode = #tpu.pipeline_mode<synchronous>, transform_indices = @transform_3, window_bounds = array<i64: 1, 4>}, {pipeline_mode = #tpu.pipeline_mode<synchronous>, transform_indices = @transform_4, window_bounds = array<i64: 8, 4>}, {pipeline_mode = #tpu.pipeline_mode<synchronous>, transform_indices = @transform_5, window_bounds = array<i64: 8, 1>}, {transform_indices = @transform_6, window_bounds = array<i64: 1, 8, 64>}]} {
    %c0 = arith.constant 0 : index
    %c0_0 = arith.constant 0 : index
    %0 = vector.load %arg4[%c0, %c0_0] : memref<9x4xf32, #tpu.memory_space<vmem>>, vector<9x4xf32>
    %c0_1 = arith.constant 0 : index
    %c0_2 = arith.constant 0 : index
    %c0_3 = arith.constant 0 : index
    %c0_4 = arith.constant 0 : index
    %c0_5 = arith.constant 0 : index
    %1 = vector.load %arg2[%c0_1, %c0_2, %c0_3, %c0_4, %c0_5] : memref<1x4x8x9x4xf32, #tpu.memory_space<vmem>>, vector<1x1x8x8x4xf32>
    %2 = vector.shape_cast %1 : vector<1x1x8x8x4xf32> to vector<8x8x4xf32>
    %3 = vector.extract_strided_slice %0 {offsets = [0, 0], sizes = [1, 4], strides = [1, 1]} : vector<9x4xf32> to vector<1x4xf32>
    %4 = vector.shape_cast %3 : vector<1x4xf32> to vector<4xf32>
    %5 = vector.shape_cast %4 : vector<4xf32> to vector<1x1x4xf32>
    %6 = vector.broadcast %5 : vector<1x1x4xf32> to vector<8x8x4xf32>
    %7 = arith.mulf %2, %6 : vector<8x8x4xf32>
    %c0_6 = arith.constant 0 : index
    %c1 = arith.constant 1 : index
    %c0_7 = arith.constant 0 : index
    %c0_8 = arith.constant 0 : index
    %c0_9 = arith.constant 0 : index
    %8 = vector.load %arg2[%c0_6, %c1, %c0_7, %c0_8, %c0_9] : memref<1x4x8x9x4xf32, #tpu.memory_space<vmem>>, vector<1x1x8x8x4xf32>
    %9 = vector.shape_cast %8 : vector<1x1x8x8x4xf32> to vector<8x8x4xf32>
    %10 = vector.extract_strided_slice %0 {offsets = [1, 0], sizes = [1, 4], strides = [1, 1]} : vector<9x4xf32> to vector<1x4xf32>
    %11 = vector.shape_cast %10 : vector<1x4xf32> to vector<4xf32>
    %12 = vector.shape_cast %11 : vector<4xf32> to vector<1x1x4xf32>
    %13 = vector.broadcast %12 : vector<1x1x4xf32> to vector<8x8x4xf32>
    %14 = arith.mulf %9, %13 : vector<8x8x4xf32>
    %15 = arith.addf %7, %14 : vector<8x8x4xf32>
    %c0_10 = arith.constant 0 : index
    %c0_11 = arith.constant 0 : index
    %c0_12 = arith.constant 0 : index
    %c1_13 = arith.constant 1 : index
    %c0_14 = arith.constant 0 : index
    %16 = vector.load %arg2[%c0_10, %c0_11, %c0_12, %c1_13, %c0_14] : memref<1x4x8x9x4xf32, #tpu.memory_space<vmem>>, vector<1x1x8x8x4xf32>
    %17 = vector.shape_cast %16 : vector<1x1x8x8x4xf32> to vector<8x8x4xf32>
    %18 = vector.extract_strided_slice %0 {offsets = [2, 0], sizes = [1, 4], strides = [1, 1]} : vector<9x4xf32> to vector<1x4xf32>
    %19 = vector.shape_cast %18 : vector<1x4xf32> to vector<4xf32>
    %20 = vector.shape_cast %19 : vector<4xf32> to vector<1x1x4xf32>
    %21 = vector.broadcast %20 : vector<1x1x4xf32> to vector<8x8x4xf32>
    %22 = arith.mulf %17, %21 : vector<8x8x4xf32>
    %23 = arith.addf %15, %22 : vector<8x8x4xf32>
    %c0_15 = arith.constant 0 : index
    %c2 = arith.constant 2 : index
    %c0_16 = arith.constant 0 : index
    %c0_17 = arith.constant 0 : index
    %c0_18 = arith.constant 0 : index
    %24 = vector.load %arg2[%c0_15, %c2, %c0_16, %c0_17, %c0_18] : memref<1x4x8x9x4xf32, #tpu.memory_space<vmem>>, vector<1x1x8x8x4xf32>
    %25 = vector.shape_cast %24 : vector<1x1x8x8x4xf32> to vector<8x8x4xf32>
    %26 = vector.extract_strided_slice %0 {offsets = [3, 0], sizes = [1, 4], strides = [1, 1]} : vector<9x4xf32> to vector<1x4xf32>
    %27 = vector.shape_cast %26 : vector<1x4xf32> to vector<4xf32>
    %28 = vector.shape_cast %27 : vector<4xf32> to vector<1x1x4xf32>
    %29 = vector.broadcast %28 : vector<1x1x4xf32> to vector<8x8x4xf32>
    %30 = arith.mulf %25, %29 : vector<8x8x4xf32>
    %31 = arith.addf %23, %30 : vector<8x8x4xf32>
    %c0_19 = arith.constant 0 : index
    %c3 = arith.constant 3 : index
    %c0_20 = arith.constant 0 : index
    %c0_21 = arith.constant 0 : index
    %c0_22 = arith.constant 0 : index
    %32 = vector.load %arg2[%c0_19, %c3, %c0_20, %c0_21, %c0_22] : memref<1x4x8x9x4xf32, #tpu.memory_space<vmem>>, vector<1x1x8x8x4xf32>
    %33 = vector.shape_cast %32 : vector<1x1x8x8x4xf32> to vector<8x8x4xf32>
    %34 = vector.extract_strided_slice %0 {offsets = [4, 0], sizes = [1, 4], strides = [1, 1]} : vector<9x4xf32> to vector<1x4xf32>
    %35 = vector.shape_cast %34 : vector<1x4xf32> to vector<4xf32>
    %36 = vector.shape_cast %35 : vector<4xf32> to vector<1x1x4xf32>
    %37 = vector.broadcast %36 : vector<1x1x4xf32> to vector<8x8x4xf32>
    %38 = arith.mulf %33, %37 : vector<8x8x4xf32>
    %39 = arith.addf %31, %38 : vector<8x8x4xf32>
    %c0_23 = arith.constant 0 : index
    %c2_24 = arith.constant 2 : index
    %c0_25 = arith.constant 0 : index
    %c1_26 = arith.constant 1 : index
    %c0_27 = arith.constant 0 : index
    %40 = vector.load %arg2[%c0_23, %c2_24, %c0_25, %c1_26, %c0_27] : memref<1x4x8x9x4xf32, #tpu.memory_space<vmem>>, vector<1x1x8x8x4xf32>
    %41 = vector.shape_cast %40 : vector<1x1x8x8x4xf32> to vector<8x8x4xf32>
    %42 = vector.extract_strided_slice %0 {offsets = [5, 0], sizes = [1, 4], strides = [1, 1]} : vector<9x4xf32> to vector<1x4xf32>
    %43 = vector.shape_cast %42 : vector<1x4xf32> to vector<4xf32>
    %44 = vector.shape_cast %43 : vector<4xf32> to vector<1x1x4xf32>
    %45 = vector.broadcast %44 : vector<1x1x4xf32> to vector<8x8x4xf32>
    %46 = arith.mulf %41, %45 : vector<8x8x4xf32>
    %47 = arith.addf %39, %46 : vector<8x8x4xf32>
    %c0_28 = arith.constant 0 : index
    %c0_29 = arith.constant 0 : index
    %c1_30 = arith.constant 1 : index
    %c0_31 = arith.constant 0 : index
    %c0_32 = arith.constant 0 : index
    %48 = vector.load %arg2[%c0_28, %c0_29, %c1_30, %c0_31, %c0_32] : memref<1x4x8x9x4xf32, #tpu.memory_space<vmem>>, vector<1x1x7x8x4xf32>
    %49 = vector.shape_cast %48 : vector<1x1x7x8x4xf32> to vector<7x8x4xf32>
    %c0_33 = arith.constant 0 : index
    %c0_34 = arith.constant 0 : index
    %c0_35 = arith.constant 0 : index
    %c0_36 = arith.constant 0 : index
    %c0_37 = arith.constant 0 : index
    %50 = vector.load %arg3[%c0_33, %c0_34, %c0_35, %c0_36, %c0_37] : memref<1x2x1x9x4xf32, #tpu.memory_space<vmem>>, vector<1x1x1x8x4xf32>
    %51 = vector.shape_cast %50 : vector<1x1x1x8x4xf32> to vector<1x8x4xf32>
    %52 = tpu.concatenate %49, %51 in 0 : vector<7x8x4xf32>, vector<1x8x4xf32> -> vector<8x8x4xf32>
    %53 = vector.extract_strided_slice %0 {offsets = [6, 0], sizes = [1, 4], strides = [1, 1]} : vector<9x4xf32> to vector<1x4xf32>
    %54 = vector.shape_cast %53 : vector<1x4xf32> to vector<4xf32>
    %55 = vector.shape_cast %54 : vector<4xf32> to vector<1x1x4xf32>
    %56 = vector.broadcast %55 : vector<1x1x4xf32> to vector<8x8x4xf32>
    %57 = arith.mulf %52, %56 : vector<8x8x4xf32>
    %58 = arith.addf %47, %57 : vector<8x8x4xf32>
    %c0_38 = arith.constant 0 : index
    %c1_39 = arith.constant 1 : index
    %c1_40 = arith.constant 1 : index
    %c0_41 = arith.constant 0 : index
    %c0_42 = arith.constant 0 : index
    %59 = vector.load %arg2[%c0_38, %c1_39, %c1_40, %c0_41, %c0_42] : memref<1x4x8x9x4xf32, #tpu.memory_space<vmem>>, vector<1x1x7x8x4xf32>
    %60 = vector.shape_cast %59 : vector<1x1x7x8x4xf32> to vector<7x8x4xf32>
    %c0_43 = arith.constant 0 : index
    %c1_44 = arith.constant 1 : index
    %c0_45 = arith.constant 0 : index
    %c0_46 = arith.constant 0 : index
    %c0_47 = arith.constant 0 : index
    %61 = vector.load %arg3[%c0_43, %c1_44, %c0_45, %c0_46, %c0_47] : memref<1x2x1x9x4xf32, #tpu.memory_space<vmem>>, vector<1x1x1x8x4xf32>
    %62 = vector.shape_cast %61 : vector<1x1x1x8x4xf32> to vector<1x8x4xf32>
    %63 = tpu.concatenate %60, %62 in 0 : vector<7x8x4xf32>, vector<1x8x4xf32> -> vector<8x8x4xf32>
    %64 = vector.extract_strided_slice %0 {offsets = [7, 0], sizes = [1, 4], strides = [1, 1]} : vector<9x4xf32> to vector<1x4xf32>
    %65 = vector.shape_cast %64 : vector<1x4xf32> to vector<4xf32>
    %66 = vector.shape_cast %65 : vector<4xf32> to vector<1x1x4xf32>
    %67 = vector.broadcast %66 : vector<1x1x4xf32> to vector<8x8x4xf32>
    %68 = arith.mulf %63, %67 : vector<8x8x4xf32>
    %69 = arith.addf %58, %68 : vector<8x8x4xf32>
    %c0_48 = arith.constant 0 : index
    %c0_49 = arith.constant 0 : index
    %c1_50 = arith.constant 1 : index
    %c1_51 = arith.constant 1 : index
    %c0_52 = arith.constant 0 : index
    %70 = vector.load %arg2[%c0_48, %c0_49, %c1_50, %c1_51, %c0_52] : memref<1x4x8x9x4xf32, #tpu.memory_space<vmem>>, vector<1x1x7x8x4xf32>
    %71 = vector.shape_cast %70 : vector<1x1x7x8x4xf32> to vector<7x8x4xf32>
    %c0_53 = arith.constant 0 : index
    %c0_54 = arith.constant 0 : index
    %c0_55 = arith.constant 0 : index
    %c1_56 = arith.constant 1 : index
    %c0_57 = arith.constant 0 : index
    %72 = vector.load %arg3[%c0_53, %c0_54, %c0_55, %c1_56, %c0_57] : memref<1x2x1x9x4xf32, #tpu.memory_space<vmem>>, vector<1x1x1x8x4xf32>
    %73 = vector.shape_cast %72 : vector<1x1x1x8x4xf32> to vector<1x8x4xf32>
    %74 = tpu.concatenate %71, %73 in 0 : vector<7x8x4xf32>, vector<1x8x4xf32> -> vector<8x8x4xf32>
    %75 = vector.extract_strided_slice %0 {offsets = [8, 0], sizes = [1, 4], strides = [1, 1]} : vector<9x4xf32> to vector<1x4xf32>
    %76 = vector.shape_cast %75 : vector<1x4xf32> to vector<4xf32>
    %77 = vector.shape_cast %76 : vector<4xf32> to vector<1x1x4xf32>
    %78 = vector.broadcast %77 : vector<1x1x4xf32> to vector<8x8x4xf32>
    %79 = arith.mulf %74, %78 : vector<8x8x4xf32>
    %80 = arith.addf %69, %79 : vector<8x8x4xf32>
    %c0_58 = arith.constant 0 : index
    %c0_59 = arith.constant 0 : index
    %81 = vector.load %arg5[%c0_58, %c0_59] : memref<1x4xf32, #tpu.memory_space<vmem>>, vector<1x4xf32>
    %82 = vector.shape_cast %81 : vector<1x4xf32> to vector<4xf32>
    %83 = vector.shape_cast %82 : vector<4xf32> to vector<1x1x4xf32>
    %84 = vector.broadcast %83 : vector<1x1x4xf32> to vector<8x8x4xf32>
    %85 = arith.addf %80, %84 : vector<8x8x4xf32>
    %cst = arith.constant 0.000000e+00 : f32
    %86 = vector.broadcast %cst : f32 to vector<8x8x4xf32>
    %87 = arith.cmpf ogt, %85, %86 : vector<8x8x4xf32>
    %cst_60 = arith.constant 1.000000e-01 : f32
    %88 = vector.broadcast %cst_60 : f32 to vector<8x8x4xf32>
    %89 = arith.mulf %88, %85 : vector<8x8x4xf32>
    %90 = arith.select %87, %85, %89 : vector<8x8x4xi1>, vector<8x8x4xf32>
    %91 = vector.shape_cast %90 : vector<8x8x4xf32> to vector<64x4xf32>
    %c0_61 = arith.constant 0 : index
    %c0_62 = arith.constant 0 : index
    %92 = vector.load %arg6[%c0_61, %c0_62] : memref<8x4xf32, #tpu.memory_space<vmem>>, vector<8x4xf32>
    %cst_63 = arith.constant dense<0.000000e+00> : vector<8x64xf32>
    %93 = tpu.matmul %92, %91, %cst_63 {dimension_numbers = #tpu.dot_dimension_numbers<[1], [1], [0], [0], [0, 0, 1, 0], [], []>} : vector<8x4xf32>, vector<64x4xf32>, vector<8x64xf32> -> vector<8x64xf32>
    %c0_64 = arith.constant 0 : index
    %c0_65 = arith.constant 0 : index
    %94 = vector.load %arg7[%c0_64, %c0_65] : memref<8x1xf32, #tpu.memory_space<vmem>>, vector<8x1xf32>
    %95 = vector.broadcast %94 : vector<8x1xf32> to vector<8x64xf32>
    %96 = arith.addf %93, %95 : vector<8x64xf32>
    %c0_66 = arith.constant 0 : index
    %c0_67 = arith.constant 0 : index
    %c0_68 = arith.constant 0 : index
    %97 = vector.load %arg8[%c0_66, %c0_67, %c0_68] : memref<1x8x64xf32, #tpu.memory_space<vmem>>, vector<1x8x64xf32>
    %98 = vector.shape_cast %97 : vector<1x8x64xf32> to vector<8x64xf32>
    %99 = vector.shape_cast %96 : vector<8x64xf32> to vector<1x8x64xf32>
    tpu.vector_store %arg8[%c0_66, %c0_67, %c0_68], %99 {strides = array<i32>} : memref<1x8x64xf32, #tpu.memory_space<vmem>>, vector<1x8x64xf32>,
    return
  }
  func.func @transform_0(%arg0: i32, %arg1: i32) -> (i32, i32, i32, i32, i32) {
    %c0_i32 = arith.constant 0 : i32
    %c0_i32_0 = arith.constant 0 : i32
    %c0_i32_1 = arith.constant 0 : i32
    %c0_i32_2 = arith.constant 0 : i32
    return %arg0, %c0_i32, %arg1, %c0_i32_0, %c0_i32_1 : i32, i32, i32, i32, i32
  }
  func.func @transform_1(%arg0: i32, %arg1: i32) -> (i32, i32, i32, i32, i32) {
    %c1_i32 = arith.constant 1 : i32
    %0 = arith.addi %arg1, %c1_i32 : i32
    %c8_i32 = arith.constant 8 : i32
    %1 = arith.muli %0, %c8_i32 : i32
    %c0_i32 = arith.constant 0 : i32
    %c0_i32_0 = arith.constant 0 : i32
    %c0_i32_1 = arith.constant 0 : i32
    %c0_i32_2 = arith.constant 0 : i32
    return %arg0, %c0_i32, %1, %c0_i32_0, %c0_i32_1 : i32, i32, i32, i32, i32
  }
  func.func @transform_2(%arg0: i32, %arg1: i32) -> (i32, i32) {
    %c0_i32 = arith.constant 0 : i32
    %c0_i32_0 = arith.constant 0 : i32
    %c0_i32_1 = arith.constant 0 : i32
    return %c0_i32, %c0_i32_0 : i32, i32
  }
  func.func @transform_3(%arg0: i32, %arg1: i32) -> (i32, i32) {
    %c0_i32 = arith.constant 0 : i32
    %c0_i32_0 = arith.constant 0 : i32
    %c0_i32_1 = arith.constant 0 : i32
    return %c0_i32, %c0_i32_0 : i32, i32
  }
  func.func @transform_4(%arg0: i32, %arg1: i32) -> (i32, i32) {
    %c0_i32 = arith.constant 0 : i32
    %c0_i32_0 = arith.constant 0 : i32
    %c0_i32_1 = arith.constant 0 : i32
    return %c0_i32, %c0_i32_0 : i32, i32
  }
  func.func @transform_5(%arg0: i32, %arg1: i32) -> (i32, i32) {
    %c0_i32 = arith.constant 0 : i32
    %c0_i32_0 = arith.constant 0 : i32
    %c0_i32_1 = arith.constant 0 : i32
    return %c0_i32, %c0_i32_0 : i32, i32
  }
  func.func @transform_6(%arg0: i32, %arg1: i32) -> (i32, i32, i32) {
    %c0_i32 = arith.constant 0 : i32
    %c0_i32_0 = arith.constant 0 : i32
    return %arg0, %c0_i32, %arg1 : i32, i32, i32
  }
}

</mosaic_0001>

<bundles_post_ra>
// kernel: tpu_custom_call.1
= control target key start
LH: loop header
LB: loop body
LE: loop exit
PB: predicated region body
PF: predicated region fallthrough
CT: control target
= control target key end

     0   :  { %s1891_s0 = inlined_call_operand.vmem [shape: f32[2,4,9,9,4], index: 0, kind: input, shape index: {}]   ;;  %s1892_s1 = inlined_call_operand.vmem [shape: f32[2,4,9,9,4], index: 1, kind: input, shape index: {}]   ;;  %s1893_s2 = inlined_call_operand.vmem [shape: f32[9,4], index: 2, kind: input, shape index: {}]   ;;  %s1894_s3 = inlined_call_operand.vmem [shape: f32[1,4], index: 3, kind: input, shape index: {}]   ;;  %s1895_s4 = inlined_call_operand.vmem [shape: f32[8,4], index: 4, kind: input, shape index: {}]   ;;  %s1896_s5 = inlined_call_operand.vmem [shape: f32[8,1], index: 5, kind: input, shape index: {}]   ;;  %s1897_s6 = inlined_call_operand.hbm [shape: f32[2,8,64], index: 6, kind: output, shape index: {}]  }
   0x1   :  { %1899 = sst [smem:[#allocation8_spill]] %s1891_s0 }
   0x2   :  { %11 = vsyncpa [#allocation5], 0 }
   0x3   :  { %13 = vsyncpa [#allocation5 + $0x1], 0  ;;  %s1416_s21 = smov 0   ;;  %s1418_s22 = smov 0  }
   0x4   :  { %s1420_s23 = smov 0   ;;  %s1422_s24 = smov 0  }
   0x5   :  { %s1424_s25 = smov 0   ;;  %s1426_s26 = smov 0  }
   0x6 LB: > { %s1085_s27 = sadd.s32 4294967295, %s1362_s26   ;;  %s1086_s28 = sadd.s32 4294967294, %s1362_s26   ;;  %s1362_s26 = sphi %s1426_s26, %s19_s26   ;;  %s1358_s25 = sphi %s1424_s25, %s1915_s25   ;;  %s1354_s24 = sphi %s1422_s24, %s1914_s24   ;;  %s1350_s23 = sphi %s1420_s23, %s1913_s23   ;;  %s1346_s22 = sphi %s1418_s22, %s1912_s22   ;;  %s1342_s21 = sphi %s1416_s21, %s1911_s21  }
   0x7   : > { %s31_s29 = sadd.s32 1, %s1358_s25  ;;  %s40_s30 = sadd.s32 1, %s1350_s23 }
   0x8   : > { %p33_p0 = scmp.ge.s32.totalorder %s31_s29, 2  ;;  %p47_p1 = scmp.ne.s32.totalorder %s1350_s23, %s1346_s22 }
   0x9   : > { %p48_p2 = scmp.eq.s32.totalorder %s1362_s26, 0  ;;  %p195_p3 = scmp.eq.s32.totalorder %s1085_s27, 1 }
   0xa   : > { %s1917_s29 = smov (%p33_p0, %s31_s29), 0  ;;  %p200_p6 = scmp.ne.s32.totalorder %s1346_s22, %s1342_s21 }
   0xb   : > { %1900 = sst [smem:[#allocation7_spill]] %s1917_s29  ;;  %p1455_p4 = por %p48_p2, %p47_p1 }
   0xc   : > { %p1459_p5 = por %p195_p3, %p47_p1  ;;  %s35_s9 = ssub.s32 %s1358_s25, %s1917_s29 }
   0xd   : > { %p38_p7 = scmp.eq.s32.totalorder %s35_s9, 0  ;;  %p201_p8 = scmp.eq.s32.totalorder %s1086_s28, 1 }
   0xe   : > { %p1088_p10 = scmp.ge.s32.totalorder %s1362_s26, 2 }
   0xf   : > { %s1468_s10 = scalar_select %p38_p7, %s1350_s23, %s40_s30  }
  0x10   : > { %p1470_p9 = por %p201_p8, %p200_p6  ;;  %229 = sbr.rel (%p1088_p10) target bundleno = 73 (0x49), region = 32 }
  0x15   : > { %232 = sbr.rel (!%p1455_p4) target bundleno = 64 (0x40), region = 36  ;;  %s234_s12 = sand.u32 (%p1455_p4), 1, %s1350_s23  }
  0x16   : > { %s1176_s13 = smul.u32 (%p1455_p4), 576, %s1358_s25  ;;  %s1481_s14 = sshll.u32 (%p1455_p4), %s234_s12, 9 }
  0x17   : > { %s1904_s0 = sld [smem:[#allocation8_spill]] (%p1455_p4)  ;;  %s236_s18 = scalar_lea.vmem (%p1455_p4), [#allocation2], %s1481_s14  }
  0x18   : > { %s1905_s19 = smov (%p1455_p4), %s236_s18  ;;  %s1496_s27 = smov (%p1455_p4), 0  }
  0x19   : > { %s1498_s28 = smov (%p1455_p4), 0  }
  0x1d   : > { %s1486_s17 = scalar_lea.vmem %s1904_s0, %s1176_s13  }
  0x1e   : > { %s1906_s20 = smov %s1486_s17 }
  0x1f LB: >> { %v383_v0 = vld [vmem:[%s1370_s20] sm:$0xff]  ;;  %v385_v1 = vld [vmem:[%s1370_s20 + $0x8] sm:$0xff]  ;;  %v387_v2 = vld [vmem:[%s1370_s20 + $0x10] sm:$0xff]  ;;  %s447_s30 = sadd.s32 1, %s1374_s27  ;;  %s377_s28 = sadd.s32 1, %s1378_s28   ;;  %s1378_s28 = sphi %s1498_s28, %s377_s28   ;;  %s1374_s27 = sphi %s1496_s27, %s1909_s27   ;;  %s1370_s20 = sphi %s1906_s20, %s1908_s20   ;;  %s1366_s19 = sphi %s1905_s19, %s1907_s19  }
  0x20   : >> { %384 = vst [vmem:[%s1366_s19] sm:$0xff] %v383_v0  ;;  %v389_v3 = vld [vmem:[%s1370_s20 + $0x18] sm:$0xff]  ;;  %p448_p11 = scmp.ge.s32.totalorder %s447_s30, 2  ;;  %v391_v4 = vld [vmem:[%s1370_s20 + $0x20] sm:$0xff]  ;;  %v393_v5 = vld [vmem:[%s1370_s20 + $0x28] sm:$0xff]  ;;  %p376_p12 = scmp.ge.s32.totalorder %s377_s28, 2 }
  0x21   : >> { %386 = vst [vmem:[%s1366_s19 + $0x8] sm:$0xff] %v385_v1  ;;  %v395_v6 = vld [vmem:[%s1370_s20 + $0x30] sm:$0xff]  ;;  %v397_v7 = vld [vmem:[%s1370_s20 + $0x38] sm:$0xff]  ;;  %v403_v10 = vld [vmem:[%s1370_s20 + $0xa0] sm:$0xff] }
  0x22   : >> { %388 = vst [vmem:[%s1366_s19 + $0x10] sm:$0xff] %v387_v2  ;;  %s1919_s30 = smov (%p448_p11, %s447_s30), 0  ;;  %v399_v8 = vld [vmem:[%s1370_s20 + $0x90] sm:$0xff]  ;;  %v401_v9 = vld [vmem:[%s1370_s20 + $0x98] sm:$0xff]  ;;  %v405_v11 = vld [vmem:[%s1370_s20 + $0xa8] sm:$0xff] }
  0x23   : >> { %390 = vst [vmem:[%s1366_s19 + $0x18] sm:$0xff] %v389_v3  ;;  %s1091_s9 = sshll.u32 %s1919_s30, 6  ;;  %v407_v12 = vld [vmem:[%s1370_s20 + $0xb0] sm:$0xff]  ;;  %v409_v13 = vld [vmem:[%s1370_s20 + $0xb8] sm:$0xff]  ;;  %v411_v14 = vld [vmem:[%s1370_s20 + $0xc0] sm:$0xff]  ;;  %s1909_s27 = smov %s1919_s30 }
  0x24   : >> { %392 = vst [vmem:[%s1366_s19 + $0x20] sm:$0xff] %v391_v4  ;;  %s1529_s12 = scalar_lea.vmem %s1486_s17, %s1091_s9   ;;  %s1533_s13 = scalar_lea.vmem %s236_s18, %s1091_s9 [#allocation2]   ;;  %v413_v15 = vld [vmem:[%s1370_s20 + $0xc8] sm:$0xff]  ;;  %v415_v16 = vld [vmem:[%s1370_s20 + $0x120] sm:$0xff]  ;;  %v419_v18 = vld [vmem:[%s1370_s20 + $0x130] sm:$0xff] }
  0x25   : >> { %394 = vst [vmem:[%s1366_s19 + $0x28] sm:$0xff] %v393_v5  ;;  %v417_v17 = vld [vmem:[%s1370_s20 + $0x128] sm:$0xff]  ;;  %v421_v19 = vld [vmem:[%s1370_s20 + $0x138] sm:$0xff]  ;;  %v423_v20 = vld [vmem:[%s1370_s20 + $0x140] sm:$0xff] }
  0x26   : >> { %396 = vst [vmem:[%s1366_s19 + $0x30] sm:$0xff] %v395_v6  ;;  %v425_v21 = vld [vmem:[%s1370_s20 + $0x148] sm:$0xff]  ;;  %v427_v22 = vld [vmem:[%s1370_s20 + $0x150] sm:$0xff]  ;;  %v429_v23 = vld [vmem:[%s1370_s20 + $0x158] sm:$0xff] }
  0x27   : >> { %398 = vst [vmem:[%s1366_s19 + $0x38] sm:$0xff] %v397_v7  ;;  %v431_v24 = vld [vmem:[%s1370_s20 + $0x1b0] sm:$0xff]  ;;  %v433_v25 = vld [vmem:[%s1370_s20 + $0x1b8] sm:$0xff]  ;;  %v435_v26 = vld [vmem:[%s1370_s20 + $0x1c0] sm:$0xff] }
  0x28   : >> { %400 = vst [vmem:[%s1366_s19 + $0x80] sm:$0xff] %v399_v8  ;;  %v437_v27 = vld [vmem:[%s1370_s20 + $0x1c8] sm:$0xff]  ;;  %v439_v28 = vld [vmem:[%s1370_s20 + $0x1d0] sm:$0xff]  ;;  %v441_v29 = vld [vmem:[%s1370_s20 + $0x1d8] sm:$0xff] }
  0x29   : >> { %402 = vst [vmem:[%s1366_s19 + $0x88] sm:$0xff] %v401_v9  ;;  %v443_v30 = vld [vmem:[%s1370_s20 + $0x1e0] sm:$0xff]  ;;  %v445_v31 = vld [vmem:[%s1370_s20 + $0x1e8] sm:$0xff]  ;;  %s1908_s20 = smov %s1529_s12 }
  0x2a   : >> { %404 = vst [vmem:[%s1366_s19 + $0x90] sm:$0xff] %v403_v10 }
  0x2b   : >> { %406 = vst [vmem:[%s1366_s19 + $0x98] sm:$0xff] %v405_v11 }
  0x2c   : >> { %408 = vst [vmem:[%s1366_s19 + $0xa0] sm:$0xff] %v407_v12 }
  0x2d   : >> { %410 = vst [vmem:[%s1366_s19 + $0xa8] sm:$0xff] %v409_v13 }
  0x2e   : >> { %412 = vst [vmem:[%s1366_s19 + $0xb0] sm:$0xff] %v411_v14 }
  0x2f   : >> { %414 = vst [vmem:[%s1366_s19 + $0xb8] sm:$0xff] %v413_v15 }
  0x30   : >> { %416 = vst [vmem:[%s1366_s19 + $0x100] sm:$0xff] %v415_v16 }
  0x31   : >> { %418 = vst [vmem:[%s1366_s19 + $0x108] sm:$0xff] %v417_v17 }
  0x32   : >> { %420 = vst [vmem:[%s1366_s19 + $0x110] sm:$0xff] %v419_v18 }
  0x33   : >> { %422 = vst [vmem:[%s1366_s19 + $0x118] sm:$0xff] %v421_v19 }
  0x34   : >> { %424 = vst [vmem:[%s1366_s19 + $0x120] sm:$0xff] %v423_v20 }
  0x35   : >> { %426 = vst [vmem:[%s1366_s19 + $0x128] sm:$0xff] %v425_v21 }
  0x36   : >> { %428 = vst [vmem:[%s1366_s19 + $0x130] sm:$0xff] %v427_v22 }
  0x37   : >> { %430 = vst [vmem:[%s1366_s19 + $0x138] sm:$0xff] %v429_v23 }
  0x38   : >> { %432 = vst [vmem:[%s1366_s19 + $0x180] sm:$0xff] %v431_v24 }
  0x39   : >> { %434 = vst [vmem:[%s1366_s19 + $0x188] sm:$0xff] %v433_v25 }
  0x3a   : >> { %436 = vst [vmem:[%s1366_s19 + $0x190] sm:$0xff] %v435_v26 }
  0x3b   : >> { %438 = vst [vmem:[%s1366_s19 + $0x198] sm:$0xff] %v437_v27  ;;  %379 = sbr.rel (!%p376_p12) target bundleno = 31 (0x1f), region = 196 }
  0x3c   : >> { %440 = vst [vmem:[%s1366_s19 + $0x1a0] sm:$0xff] %v439_v28 }
  0x3d   : >> { %442 = vst [vmem:[%s1366_s19 + $0x1a8] sm:$0xff] %v441_v29 }
  0x3e   : >> { %444 = vst [vmem:[%s1366_s19 + $0x1b0] sm:$0xff] %v443_v30 }
  0x3f   : >> { %446 = vst [vmem:[%s1366_s19 + $0x1b8] sm:$0xff] %v445_v31  ;;  %s1907_s19 = smov %s1533_s13 }
  0x40 PF: > { %490 = sbr.rel (!%p1455_p4) target bundleno = 73 (0x49), region = 88  ;;  %s492_s15 = sand.u32 (%p1455_p4), 1, %s1350_s23  }
  0x41   : > { %s1100_s16 = smul.u32 (%p1455_p4), 576, %s1358_s25  ;;  %s1099_s9 = sshll.u32 (%p1455_p4), %s492_s15, 5 }
  0x42   : > { %s494_s30 = scalar_lea.vmem (%p1455_p4), [#allocation3], %s1099_s9 }
  0x43   : > { %s996_s13 = scalar_lea.vmem (%p1455_p4), %s1892_s1, %s1100_s16 }
  0x44   : > { %v1101_v32 = vld [vmem:[%s996_s13 + $0x80] sm:$0xff] (%p1455_p4)  ;;  %v1102_v33 = vld [vmem:[%s996_s13 + $0x88] sm:$0xff] (%p1455_p4)  ;;  %v1103_v34 = vld [vmem:[%s996_s13 + $0x110] sm:$0xff] (%p1455_p4) }
  0x45   : > { %537 = vst [vmem:[%s494_s30] sm:$0xff] %v1101_v32  ;;  %v1104_v35 = vld [vmem:[%s996_s13 + $0x118] sm:$0xff] }
  0x46   : > { %539 = vst [vmem:[%s494_s30 + $0x8] sm:$0xff] %v1102_v33 }
  0x47   : > { %541 = vst [vmem:[%s494_s30 + $0x10] sm:$0xff] %v1103_v34 }
  0x48   : > { %543 = vst [vmem:[%s494_s30 + $0x18] sm:$0xff] %v1104_v35 }
  0x49 PF: > { %p1105_p13 = scmp.ge.s32.totalorder %s1362_s26, 1  ;;  %p548_p0 = scmp.lt.s32.totalorder %s1362_s26, 3 }
  0x4b   : > { %p549_p1 = pnand %p1105_p13, %p548_p0 }
  0x4c   : > { %s1606_s0 = sand.u32 (!%p549_p1), 1, %s1346_s22   ;;  %s1173_s29 = sshll.u32 (!%p549_p1), %s1354_s24, 3 }
  0x4d   : > { %552 = sbr.rel (%p549_p1) target bundleno = 273 (0x111), region = 126  ;;  %s1106_s14 = sshll.u32 (!%p549_p1), %s1606_s0, 9 }
  0x4e   : > { %s1107_s17 = sshll.u32 (!%p549_p1), %s1606_s0, 5  ;;  %s1630_s20 = scalar_lea.vmem (!%p549_p1), [#allocation2], %s1106_s14 }
  0x4f   : > { %s564_s27 = scalar_lea.vmem (!%p549_p1), [#allocation3], %s1107_s17  ;;  %s1108_s30 = sshll.u32 (!%p549_p1), %s1606_s0, 3 }
  0x50   : > { %s933_s17 = scalar_lea.hbm (!%p549_p1), %s1897_s6, %s1173_s29  ;;  %s594_s18 = scalar_lea.vmem (!%p549_p1), [#allocation4], %s1108_s30 }
  0x51   : > { %s935_s19 = sshll.u32 (!%p549_p1), %s594_s18, 4  ;;  %s1288_s16 = scalar_lea.hbm (!%p549_p1), %s1897_s6, 16  ;;  %s936_s19 = int_to_ptr.vmem [resolvable:$true] %s935_s19 }
  0x52   : > { %v603_v36 = vld [vmem:[%s1893_s2] sm:$0xff]  ;;  %v1628_v43 = vld [vmem:[%s1893_s2 + $0x8] ss:$0 sm:$0xff]  ;;  %v612_v44 = vld [vmem:[%s1630_s20 + $0x70] sm:$0xff]  ;;  %vm871_vm0 = vcmask 31744   ;;  %vm919_vm9 = vcmask 523264  }
  0x53   : > { %v1613_v37 = vperm.slane %v603_v36, 0  ;;  %v1615_v38 = vperm.slane %v603_v36, 1  ;;  %v1617_v39 = vperm.slane %v603_v36, 2  ;;  %v1619_v40 = vperm.slane %v603_v36, 3  ;;  %v1116_v45 = vld [vmem:[%s1630_s20 + $0xf0] sm:$0xff]  ;;  %v758_v56 = vld [vmem:[%s564_s27] sm:$0xff] }
  0x54   : > { %v1621_v41 = vperm.slane %v603_v36, 4  ;;  %v1623_v42 = vperm.slane %v603_v36, 5  ;;  %v655_v46 = vld [vmem:[%s1630_s20 + $0x71] sm:$0xff]  ;;  %v1635_v47 = vperm.slane %v603_v36, 6  ;;  %v1637_v48 = vperm.slane %v603_v36, 7  ;;  %v810_v58 = vld [vmem:[%s564_s27 + $0x1] sm:$0xff] }
  0x55   : > { %v621_v49 = vmul.f32 %v1613_v37, %v612_v44  ;;  %v639_v50 = vmul.f32 %v1116_v45, %v1615_v38  ;;  %v664_v51 = vmul.f32 %v1617_v39, %v655_v46  ;;  %v1124_v52 = vld [vmem:[%s1630_s20 + $0x170] sm:$0xff]  ;;  %v611_v63 = vld [vmem:[%s1630_s20 + $0x60] sm:$0xff]  ;;  %v1660_v3 = vmul.f32 %v1628_v43, %v810_v58 }
  0x56   : > { %v1132_v53 = vld [vmem:[%s1630_s20 + $0x1f0] sm:$0xff]  ;;  %v690_v55 = vmul.f32 %v1124_v52, %v1619_v40  ;;  %v1647_v59 = vmul.f32 %v1635_v47, %v612_v44  ;;  %v1653_v0 = vmul.f32 %v1116_v45, %v1637_v48  ;;  %v767_v1 = vmul.f32 %v1635_v47, %v758_v56  ;;  %v1115_v5 = vld [vmem:[%s1630_s20 + $0xe0] sm:$0xff] }
  0x57   : > { %v1140_v54 = vld [vmem:[%s1630_s20 + $0x171] sm:$0xff]  ;;  %v647_v60 = vadd.f32 %v639_v50, %v621_v49  ;;  %v716_v61 = vmul.f32 %v1132_v53, %v1621_v41  ;;  %v620_v4 = vmul.f32 %v1613_v37, %v611_v63  ;;  %v654_v6 = vld [vmem:[%s1630_s20 + $0x61] sm:$0xff]  ;;  %v638_v9 = vmul.f32 %v1115_v5, %v1615_v38 }
  0x58   : > { %v1155_v57 = vld [vmem:[%s564_s27 + $0x10] sm:$0xff]  ;;  %v741_v62 = vmul.f32 %v1140_v54, %v1623_v42  ;;  %v1123_v7 = vld [vmem:[%s1630_s20 + $0x160] sm:$0xff]  ;;  %v663_v10 = vmul.f32 %v1617_v39, %v654_v6  ;;  %v1671_v13 = vmul.f32 %v1628_v43, %v655_v46  ;;  %v1681_v21 = vmul.f32 %v1635_v47, %v611_v63  ;;  %s922_s27 = scalar_lea.sflag [#allocation5], %s1606_s0 }
  0x59   : > { %v1657_v2 = vmul.f32 %v1155_v57, %v1637_v48  ;;  %v672_v8 = vadd.f32 %v664_v51, %v647_v60  ;;  %v1131_v11 = vld [vmem:[%s1630_s20 + $0x1e0] sm:$0xff]  ;;  %v610_v14 = vld [vmem:[%s1630_s20 + $0x50] sm:$0xff]  ;;  %v689_v15 = vmul.f32 %v1123_v7, %v1619_v40  ;;  %v646_v23 = vadd.f32 %v638_v9, %v620_v4 }
  0x5a   : > { %v1139_v12 = vld [vmem:[%s1630_s20 + $0x161] sm:$0xff]  ;;  %v715_v16 = vmul.f32 %v1131_v11, %v1621_v41  ;;  %v619_v17 = vmul.f32 %v1613_v37, %v610_v14  ;;  %v1114_v18 = vld [vmem:[%s1630_s20 + $0xd0] sm:$0xff]  ;;  %v1692_v32 = vmul.f32 %v1115_v5, %v1637_v48  ;;  %v1706_v52 = vmul.f32 %v1628_v43, %v654_v6 }
  0x5b   : > { %v653_v19 = vld [vmem:[%s1630_s20 + $0x51] sm:$0xff]  ;;  %v698_v22 = vadd.f32 %v690_v55, %v672_v8  ;;  %v637_v24 = vmul.f32 %v1114_v18, %v1615_v38  ;;  %v609_v28 = vld [vmem:[%s1630_s20 + $0x40] sm:$0xff]  ;;  %v740_v29 = vmul.f32 %v1139_v12, %v1623_v42  ;;  %v671_v44 = vadd.f32 %v663_v10, %v646_v23 }
  0x5c   : > { %v1122_v20 = vld [vmem:[%s1630_s20 + $0x150] sm:$0xff]  ;;  %v662_v25 = vmul.f32 %v1617_v39, %v653_v19  ;;  %v1695_v33 = vld [vmem:[%s1630_s20 + $0xc0] sm:$0xff]  ;;  %v618_v46 = vmul.f32 %v1613_v37, %v609_v28  ;;  %v764_v7 = vmul.f32 %v1635_v47, %v610_v14 }
  0x5d   : > { %v1130_v26 = vld [vmem:[%s1630_s20 + $0x1d0] sm:$0xff]  ;;  %v688_v30 = vmul.f32 %v1122_v20, %v1619_v40  ;;  %v1698_v34 = vld [vmem:[%s1630_s20 + $0x41] sm:$0xff]  ;;  %v724_v36 = vadd.f32 %v716_v61, %v698_v22  ;;  %v645_v45 = vadd.f32 %v637_v24, %v619_v17  ;;  %v636_v53 = vmul.f32 %v1695_v33, %v1615_v38  ;;  %v1739_v22 = vld [vmem:[%s1894_s3] ss:$0 sm:$0xff] }
  0x5e   : > { %v1138_v27 = vld [vmem:[%s1630_s20 + $0x151] sm:$0xff]  ;;  %v714_v31 = vmul.f32 %v1130_v26, %v1621_v41  ;;  %v1121_v35 = vld [vmem:[%s1630_s20 + $0x140] sm:$0xff]  ;;  %v661_v54 = vmul.f32 %v1617_v39, %v1698_v34  ;;  %v697_v57 = vadd.f32 %v689_v15, %v671_v44  ;;  %v791_v17 = vmul.f32 %v1114_v18, %v1637_v48 }
  0x5f   : > { %v1129_v49 = vld [vmem:[%s1630_s20 + $0x1c0] sm:$0xff]  ;;  %v739_v51 = vmul.f32 %v1138_v27, %v1623_v42  ;;  %v1713_v55 = vld [vmem:[%s1630_s20 + $0x30] sm:$0xff]  ;;  %v749_v56 = vadd.f32 %v741_v62, %v724_v36  ;;  %v670_v58 = vadd.f32 %v662_v25, %v645_v45  ;;  %v687_v60 = vmul.f32 %v1121_v35, %v1619_v40 }
  0x60   : > { %v1137_v50 = vld [vmem:[%s1630_s20 + $0x141] sm:$0xff]  ;;  %v1717_v61 = vld [vmem:[%s1630_s20 + $0xb0] sm:$0xff]  ;;  %v644_v4 = vadd.f32 %v636_v53, %v618_v46  ;;  %v713_v5 = vmul.f32 %v1129_v49, %v1621_v41  ;;  %v723_v62 = vadd.f32 %v715_v16, %v697_v57  ;;  %v617_v10 = vmul.f32 %v1613_v37, %v1713_v55 }
  0x61   : > { %v1720_v63 = vld [vmem:[%s1630_s20 + $0x31] sm:$0xff]  ;;  %v738_v6 = vmul.f32 %v1137_v50, %v1623_v42  ;;  %v775_v8 = vadd.f32 %v767_v1, %v749_v56  ;;  %v696_v9 = vadd.f32 %v688_v30, %v670_v58  ;;  %v635_v20 = vmul.f32 %v1717_v61, %v1615_v38  ;;  %v1743_v18 = vld [vmem:[%s1630_s20 + $0x20] sm:$0xff] }
  0x62   : > { %v1120_v11 = vld [vmem:[%s1630_s20 + $0x130] sm:$0xff]  ;;  %v669_v15 = vadd.f32 %v661_v54, %v644_v4  ;;  %v660_v14 = vmul.f32 %v1617_v39, %v1720_v63  ;;  %v748_v23 = vadd.f32 %v740_v29, %v723_v62  ;;  %v816_v25 = vmul.f32 %v1628_v43, %v653_v19  ;;  %v1748_v36 = vld [vmem:[%s1630_s20 + $0xa0] sm:$0xff] }
  0x63   : > { %v1128_v12 = vld [vmem:[%s1630_s20 + $0x1b0] sm:$0xff]  ;;  %v802_v16 = vadd.f32 %v1657_v2, %v775_v8  ;;  %v722_v24 = vadd.f32 %v714_v31, %v696_v9  ;;  %v643_v27 = vadd.f32 %v635_v20, %v617_v10  ;;  %v686_v30 = vmul.f32 %v1120_v11, %v1619_v40  ;;  %v1754_v31 = vld [vmem:[%s1630_s20 + $0x21] sm:$0xff] }
  0x64   : > { %v1136_v1 = vld [vmem:[%s1630_s20 + $0x131] sm:$0xff]  ;;  %v695_v26 = vadd.f32 %v687_v60, %v669_v15  ;;  %v712_v35 = vmul.f32 %v1128_v12, %v1621_v41  ;;  %v774_v44 = vadd.f32 %v1647_v59, %v748_v23  ;;  %v763_v49 = vmul.f32 %v1635_v47, %v609_v28  ;;  %v1135_v9 = vld [vmem:[%s1630_s20 + $0x121] sm:$0xff] }
  0x65   : > { %v827_v2 = vadd.f32 %v1660_v3, %v802_v16  ;;  %v747_v45 = vadd.f32 %v739_v51, %v722_v24  ;;  %v737_v29 = vmul.f32 %v1136_v1, %v1623_v42  ;;  %v668_v46 = vadd.f32 %v660_v14, %v643_v27  ;;  %v1119_v51 = vld [vmem:[%s1630_s20 + $0x120] sm:$0xff]  ;;  %v1781_v20 = vld [vmem:[%s1630_s20 + $0x10] sm:$0xff] }
  0x66   : > { %v721_v19 = vadd.f32 %v713_v5, %v695_v26  ;;  %v616_v50 = vmul.f32 %v1613_v37, %v1743_v18  ;;  %v801_v54 = vadd.f32 %v1653_v0, %v774_v44  ;;  %v634_v59 = vmul.f32 %v1748_v36, %v1615_v38  ;;  %v1791_v26 = vld [vmem:[%s1630_s20 + $0x11] sm:$0xff] }
  0x67   : > { %v839_v53 = vadd.f32 %v1739_v22, %v827_v2  ;;  %v773_v3 = vadd.f32 %v1681_v21, %v747_v45  ;;  %v694_v57 = vadd.f32 %v686_v30, %v668_v46  ;;  %v790_v58 = vmul.f32 %v1695_v33, %v1637_v48  ;;  %v1127_v21 = vld [vmem:[%s1630_s20 + $0x1a0] sm:$0xff]  ;;  %v1118_v45 = vld [vmem:[%s1630_s20 + $0x110] sm:$0xff] }
  0x68   : > { %v746_v56 = vadd.f32 %v738_v6, %v721_v19  ;;  %v659_v28 = vmul.f32 %v1617_v39, %v1754_v31  ;;  %v826_v4 = vadd.f32 %v1671_v13, %v801_v54  ;;  %v642_v62 = vadd.f32 %v634_v59, %v616_v50  ;;  %v1109_v59 = vld [vmem:[%s1630_s20 + $0x80] sm:$0xff] }
  0x69   : > { %vm847_vm1 = vcmp.gt.f32.partialorder %v839_v53, 0.0  ;;  %v855_v60 = vmul.f32 0.1, %v839_v53  ;;  %v800_v0 = vadd.f32 %v1692_v32, %v773_v3  ;;  %v720_v8 = vadd.f32 %v712_v35, %v694_v57  ;;  %v605_v3 = vld [vmem:[%s1630_s20] sm:$0xff] }
  0x6a   : > { %v772_v5 = vadd.f32 %v764_v7, %v746_v56  ;;  %v685_v6 = vmul.f32 %v1119_v51, %v1619_v40  ;;  %v838_v33 = vadd.f32 %v1739_v22, %v826_v4  ;;  %v815_v12 = vmul.f32 %v1628_v43, %v1698_v34  ;;  %v648_v51 = vld [vmem:[%s1630_s20 + $0x1] sm:$0xff] }
  0x6b   : > { %v863_v10 = vsel %vm847_vm1, %v839_v53, %v855_v60  ;;  %v825_v11 = vadd.f32 %v1706_v52, %v800_v0  ;;  %v745_v32 = vadd.f32 %v737_v29, %v720_v8  ;;  %v667_v7 = vadd.f32 %v659_v28, %v642_v62  ;;  %v1786_v52 = vld [vmem:[%s1630_s20 + $0x90] sm:$0xff] }
  0x6c   : > { %1163 = vmatpush.xpose.msk.msra.mxu0 %vm871_vm0, %v863_v10  ;;  %v799_v13 = vadd.f32 %v791_v17, %v772_v5  ;;  %v711_v15 = vmul.f32 %v1127_v21, %v1621_v41  ;;  %vm846_vm2 = vcmp.gt.f32.partialorder %v838_v33, 0.0  ;;  %v854_v14 = vmul.f32 0.1, %v838_v33  ;;  %v1134_v0 = vld [vmem:[%s1630_s20 + $0x111] sm:$0xff]  ;;  %v1117_v21 = vld [vmem:[%s1630_s20 + $0x100] sm:$0xff] }
  0x6d   : > { %v837_v1 = vadd.f32 %v1739_v22, %v825_v11  ;;  %v736_v16 = vmul.f32 %v1135_v9, %v1623_v42  ;;  %v771_v23 = vadd.f32 %v763_v49, %v745_v32  ;;  %v693_v24 = vadd.f32 %v685_v6, %v667_v7  ;;  %v1126_v49 = vld [vmem:[%s1630_s20 + $0x190] sm:$0xff]  ;;  %v1125_v6 = vld [vmem:[%s1630_s20 + $0x180] sm:$0xff] }
  0x6e   : > { %v824_v34 = vadd.f32 %v816_v25, %v799_v13  ;;  %v762_v17 = vmul.f32 %v1635_v47, %v1713_v55  ;;  %v862_v27 = vsel %vm846_vm2, %v838_v33, %v854_v14  ;;  %v615_v35 = vmul.f32 %v1613_v37, %v1781_v20  ;;  %v1133_v7 = vld [vmem:[%s1630_s20 + $0x101] sm:$0xff]  ;;  %s937_s20 = sshll.u32 %s933_s17, 4  ;;  %s938_s20 = int_to_ptr.hbm [resolvable:$true] %s937_s20 }
  0x6f   : > { %vm845_vm3 = vcmp.gt.f32.partialorder %v837_v1, 0.0  ;;  %v853_v30 = vmul.f32 0.1, %v837_v1  ;;  %v798_v2 = vadd.f32 %v790_v58, %v771_v23  ;;  %v719_v44 = vadd.f32 %v711_v15, %v693_v24  ;;  %s1282_s28 = sshra.s32 %s938_s20, 4  ;;  %s1283_s28 = int_to_ptr.hbm [resolvable:$true] %s1282_s28 }
  0x70   : > { %1164 = vmatpush.xpose.msk.msra.mxu0 %vm871_vm0, %v862_v27  ;;  %v836_v25 = vadd.f32 %v1739_v22, %v824_v34  ;;  %v633_v55 = vmul.f32 %v1786_v52, %v1615_v38  ;;  %v789_v19 = vmul.f32 %v1717_v61, %v1637_v48  ;;  %v658_v46 = vmul.f32 %v1617_v39, %v1791_v26  ;;  %s1284_s12 = scalar_lea.hbm %s1283_s28, 8  ;;  %p1289_p6 = scmp.lt.s32.totalorder %s1283_s28, %s1897_s6 }
  0x71   : > { %v861_v29 = vsel %vm845_vm3, %v837_v1, %v853_v30  ;;  %v823_v53 = vadd.f32 %v815_v12, %v798_v2  ;;  %v744_v54 = vadd.f32 %v736_v16, %v719_v44  ;;  %v814_v56 = vmul.f32 %v1628_v43, %v1720_v63  ;;  %p1285_p2 = scmp.ne.s32.totalorder %s1283_s28, %s1284_s12  ;;  %p1290_p7 = scmp.lt.s32.totalorder %s1288_s16, %s1284_s12 }
  0x72   : > { %vm844_vm4 = vcmp.gt.f32.partialorder %v836_v25, 0.0  ;;  %v852_v50 = vmul.f32 0.1, %v836_v25  ;;  %v641_v57 = vadd.f32 %v633_v55, %v615_v35  ;;  %v684_v61 = vmul.f32 %v1118_v45, %v1619_v40 }
  0x73   : > { %v835_v28 = vadd.f32 %v1739_v22, %v823_v53  ;;  %v770_v60 = vadd.f32 %v762_v17, %v744_v54  ;;  %v710_v4 = vmul.f32 %v1126_v49, %v1621_v41  ;;  %v614_v8 = vmul.f32 %v1613_v37, %v605_v3  ;;  %p1286_p3 = pnand %p1285_p2, %p1459_p5  ;;  %p1291_p8 = por %p1290_p7, %p1289_p6 }
  0x74   : > { %1165 = vmatpush.xpose.msk.msra.mxu0 %vm871_vm0, %v861_v29  ;;  %v860_v58 = vsel %vm844_vm4, %v836_v25, %v852_v50  ;;  %v666_v5 = vadd.f32 %v658_v46, %v641_v57  ;;  %v632_v62 = vmul.f32 %v1109_v59, %v1615_v38  ;;  %v657_v63 = vmul.f32 %v1617_v39, %v648_v51  ;;  %v865_v39 = vld [vmem:[%s1896_s5] sm:$0xff] }
  0x75   : > { %vm843_vm5 = vcmp.gt.f32.partialorder %v835_v28, 0.0  ;;  %v851_v9 = vmul.f32 0.1, %v835_v28  ;;  %v797_v10 = vadd.f32 %v789_v19, %v770_v60  ;;  %v735_v11 = vmul.f32 %v1134_v0, %v1623_v42  ;;  %p1287_p4 = pneg %p1286_p3 }
  0x76   : > { %v692_v33 = vadd.f32 %v684_v61, %v666_v5  ;;  %v640_v12 = vadd.f32 %v632_v62, %v614_v8  ;;  %v683_v13 = vmul.f32 %v1117_v21, %v1619_v40  ;;  %v761_v37 = vmul.f32 %v1635_v47, %v1743_v18 }
  0x77   : > { %v822_v32 = vadd.f32 %v814_v56, %v797_v10  ;;  %v709_v38 = vmul.f32 %v1125_v6, %v1621_v41  ;;  %v859_v15 = vsel %vm843_vm5, %v835_v28, %v851_v9  ;;  %v1380_v34 = vmov 0   ;;  %p1292_p11 = pnand %p1291_p8, %p1287_p4 }
  0x78   : > { %1166 = vmatpush.xpose.msk.msra.mxu0 %vm871_vm0, %v860_v58  ;;  %v718_v14 = vadd.f32 %v710_v4, %v692_v33  ;;  %v665_v1 = vadd.f32 %v657_v63, %v640_v12  ;;  %1265 = vset.pattern.permute.xlu0 %v1380_v34  ;;  %v788_v23 = vmul.f32 %v1748_v36, %v1637_v48 }
  0x79   : > { %v834_v16 = vadd.f32 %v1739_v22, %v822_v32  ;;  %v734_v18 = vmul.f32 %v1133_v7, %v1623_v42  ;;  %868 = vperm.xlu0 %1265, %v865_v39   ;;  %v813_v27 = vmul.f32 %v1628_v43, %v1754_v31  ;;  %v760_v35 = vmul.f32 %v1635_v47, %v1781_v20 }
  0x7a   : > { %v743_v40 = vadd.f32 %v735_v11, %v718_v14  ;;  %v691_v24 = vadd.f32 %v683_v13, %v665_v1  ;;  %v787_v36 = vmul.f32 %v1786_v52, %v1637_v48  ;;  %v812_v45 = vmul.f32 %v1628_v43, %v1791_v26  ;;  %v864_v43 = vld [vmem:[%s1895_s4] sm:$0xff] }
  0x7b   : > { %vm842_vm6 = vcmp.gt.f32.partialorder %v834_v16, 0.0  ;;  %v850_v41 = vmul.f32 0.1, %v834_v16 }
  0x7c   : > { %1167 = vmatpush.xpose.msk.msra.mxu0 %vm871_vm0, %v859_v15  ;;  %v769_v17 = vadd.f32 %v761_v37, %v743_v40  ;;  %v717_v30 = vadd.f32 %v709_v38, %v691_v24 }
  0x7d   : > { %v858_v25 = vsel %vm842_vm6, %v834_v16, %v850_v41 }
  0x7e   : > { %v796_v2 = vadd.f32 %v788_v23, %v769_v17  ;;  %v742_v44 = vadd.f32 %v734_v18, %v717_v30 }
  0x80   : > { %1168 = vmatpush.xpose.msk.msra.mxu0 %vm871_vm0, %v858_v25  ;;  %v821_v42 = vadd.f32 %v813_v27, %v796_v2  ;;  %v768_v55 = vadd.f32 %v760_v35, %v742_v44 }
  0x82   : > { %v833_v31 = vadd.f32 %v1739_v22, %v821_v42  ;;  %v795_v29 = vadd.f32 %v787_v36, %v768_v55 }
  0x84   : > { %vm841_vm7 = vcmp.gt.f32.partialorder %v833_v31, 0.0  ;;  %v849_v47 = vmul.f32 0.1, %v833_v31  ;;  %v820_v20 = vadd.f32 %v812_v45, %v795_v29 }
  0x86   : > { %v857_v19 = vsel %vm841_vm7, %v833_v31, %v849_v47  ;;  %v832_v46 = vadd.f32 %v1739_v22, %v820_v20 }
  0x87   : > { %1169 = vmatpush.xpose.msk.msra.mxu0 %vm871_vm0, %v857_v19 }
  0x88   : > { %vm840_vm8 = vcmp.gt.f32.partialorder %v832_v46, 0.0  ;;  %v848_v48 = vmul.f32 0.1, %v832_v46 }
  0x8a   : > { %v856_v52 = vsel %vm840_vm8, %v832_v46, %v848_v48 }
  0x8b   : > { %1170 = vmatpush.xpose.msk.msra.mxu0 %vm871_vm0, %v856_v52 }
  0x8e   : > { %1171 = vmatmul.msk.f32.vlgmr.msra.gmra.mxu0 %vm871_vm0, %v864_v43 }
  0xeb   : > { %v869_v22 = vpop.permute.xlu0 %868 }
 0x10b   : > { %v916_v26 = vpop.f32.mrf.mxu0 }
 0x10c   : > { %v917_v49 = vadd.f32 %v916_v26, %v869_v22 }
 0x10e   : > { %920 = vst.msk [vmem:[%s594_s18] sm:$0xff] %vm919_vm9, %v917_v49 }
 0x10f   : > { %1295 = shalt.err (!%p1292_p11)
}
 0x110   : > { %1177 = dma.vmem_to_hbm [thread:$0]  (%p1459_p5), %s936_s19, 128, %s938_s20, %s922_s27  }
 0x111 PF: > { %s949_s0 = sand.u32 1, %s1342_s21   ;;  %p1180_p12 = pnand %p1088_p10, %p1470_p9 }
 0x112   : > { %s950_s30 = scalar_lea.sflag [#allocation5], %s949_s0 }
 0x113   : > { %p1181_p13 = pneg %p1180_p12 }
 0x115   : > { %1337 = dma.done.wait (%p1181_p13), %s950_s30, 128  }
 0x116   : > { %1339 = vsyncadd (%p1181_p13), %s950_s30, 4294967168  ;;  %s19_s26 = sadd.s32 1, %s1362_s26   ;;  %s1910_s8 = sld [smem:[#allocation7_spill]] }
 0x117   : > { %p16_p0 = scmp.ge.s32.totalorder %s19_s26, 4   ;;  %s1911_s21 = smov %s1346_s22 }
 0x118   : > { %s1912_s22 = smov %s1350_s23  ;;  %s1913_s23 = smov %s1468_s10 }
 0x119   : > { %s1914_s24 = smov %s1358_s25  ;;  %18 = sbr.rel (!%p16_p0) target bundleno = 6 (0x6), region = 218 }
 0x11c   : > { %s1915_s25 = smov %s1910_s8 }
 0x11e   :  { %956 = vsyncpa [#allocation5], 1 }
 0x11f   :  { %958 = vsyncpa [#allocation5 + $0x1], 1 }

</bundles_post_ra>
